<compile_context>
chip_gen: v7x
topology: tpu7x:2x2x1
jax: 0.10.0
libtpu: 0.0.40
codegen_flags: <defaults>
</compile_context>

<pallas_src>
import functools

import jax
import jax.numpy as jnp
from jax import lax
from jax.experimental import pallas as pl
from jax.experimental.pallas import tpu as pltpu

D_IN, D_H1, D_H2, D_OUT = 71, 52, 29, 6

_TILE_B_MAX = 8192   # max rows per grid step
_LANE = 128          # tile_b granularity (keeps the transposed out block lane-aligned)


def _round_up(n, m):
    return (n + m - 1) // m * m


def _cdiv(a, b):
    return (a + b - 1) // b


def _mlp_kernel(x_ref, w1_ref, b1_ref, w2_ref, b2_ref, w3t_ref, b3c_ref, o_ref,
                *, mxu_dtype):
    # Weights arrive already in the MXU dtype (cast once in the wrapper).
    # Activations are cast on the VPU; accumulation is always f32.
    x = x_ref[...].astype(mxu_dtype)

    # fc1 + ReLU
    h1 = jnp.dot(x, w1_ref[...], preferred_element_type=jnp.float32)
    h1 = jnp.maximum(h1 + b1_ref[...], 0.0)

    # fc2 + ReLU
    h2 = jnp.dot(h1.astype(mxu_dtype), w2_ref[...], preferred_element_type=jnp.float32)
    h2 = jnp.maximum(h2 + b2_ref[...], 0.0)

    # fc3, computed transposed: h3t[n, b] = sum_k W3^T[n, k] * h2[b, k]
    # (standard a @ b.T contraction on both minor dims). Result is (6, tile_b):
    # lane-dense along the batch, so stores are unmasked and the HBM writeback
    # is 6 large contiguous rows instead of a 24 B-per-row strided copy.
    h3t = lax.dot_general(w3t_ref[...], h2.astype(mxu_dtype),
                          dimension_numbers=(((1,), (1,)), ((), ())),
                          preferred_element_type=jnp.float32)
    o_ref[...] = (h3t + b3c_ref[...]).astype(o_ref.dtype)


def _choose_tiling(batch, tile_b):
    if tile_b is None:
        # >=2 grid steps once the batch is big enough so the "parallel" batch
        # axis gives both v7x TensorCores work; tiles capped at _TILE_B_MAX.
        nsteps = max(_cdiv(batch, _TILE_B_MAX), 2 if batch > 2 * _LANE else 1)
        tile_b = _round_up(_cdiv(batch, nsteps), _LANE)
    else:
        tile_b = _round_up(tile_b, _LANE)
    nsteps = _cdiv(batch, tile_b)   # padding waste bounded by < tile_b rows
    return tile_b, nsteps


@functools.partial(jax.jit, static_argnames=("use_bf16", "tile_b"))
def car_rot_forward(x, params, use_bf16=True, tile_b=None):
    """x: (B, 71). params: (in,out) f32 weights and (1,out) f32 biases.

    use_bf16=True (default) feeds bf16 operands to the MXU (native bf16 on
    v5e/v6e/v7x); accumulation stays f32, so outputs match the f32 reference
    to roughly bf16 precision (~2-3 decimal digits).
    """
    B = x.shape[0]
    tile_b, nsteps = _choose_tiling(B, tile_b)
    padded_b = tile_b * nsteps
    if padded_b != B:
        x = jnp.pad(x, ((0, padded_b - B), (0, 0)))

    mxu_dtype = jnp.bfloat16 if use_bf16 else jnp.float32

    # One-time weight prep (tiny): cast to the MXU dtype here instead of
    # re-casting the resident VMEM blocks every grid step, and pre-transpose
    # layer 3 so the kernel emits a lane-dense (transposed) output.
    w1 = params["w1"].astype(mxu_dtype)                         # (71, 52)
    w2 = params["w2"].astype(mxu_dtype)                         # (52, 29)
    w3t = params["w3"].T.astype(mxu_dtype)                      # (6, 29)
    b1 = params["b1"].astype(jnp.float32)                       # (1, 52)
    b2 = params["b2"].astype(jnp.float32)                       # (1, 29)
    b3c = params["b3"].astype(jnp.float32).reshape(D_OUT, 1)    # (6, 1)

    x_spec = pl.BlockSpec((tile_b, D_IN), lambda i: (i, 0))
    # Transposed, lane-dense output: (6, padded_b) array, (6, tile_b) blocks.
    out_spec = pl.BlockSpec((D_OUT, tile_b), lambda i: (0, i))

    def resident(shape):
        # Same block every step -> fetched into VMEM once, never re-DMA'd.
        return pl.BlockSpec(shape, lambda i: (0, 0))

    out_t = pl.pallas_call(
        functools.partial(_mlp_kernel, mxu_dtype=mxu_dtype),
        out_shape=jax.ShapeDtypeStruct((D_OUT, padded_b), x.dtype),
        grid=(nsteps,),
        in_specs=[
            x_spec,
            resident((D_IN, D_H1)), resident((1, D_H1)),
            resident((D_H1, D_H2)), resident((1, D_H2)),
            resident((D_OUT, D_H2)), resident((D_OUT, 1)),
        ],
        out_specs=out_spec,
        compiler_params=pltpu.CompilerParams(
            # Batch axis is embarrassingly parallel -> megacore sharding on v7x.
            dimension_semantics=("parallel",),
            # Explicit scoped-VMEM limit: ~25 MiB actual footprint at tile_b=8192
            # (lane-padded buffers) exceeds v5e's 16 MiB default; 64 MiB is safe
            # on all of v5e/v6e/v7x.
            vmem_limit_bytes=64 * 1024 * 1024,
        ),
    )(x, w1, b1, w2, b2, w3t, b3c)

    # Layout plumbing only: (6, B) -> (B, 6). One tiny XLA transpose (24 B/row),
    # far cheaper than the masked/strided writeback it replaces. Padded rows
    # (which hold relu(b) garbage) are sliced off here.
    return out_t[:, :B].T


def init_params(key):
    """Deterministic PyTorch-style init: U(-1/sqrt(fan_in), 1/sqrt(fan_in))."""
    ks = jax.random.split(key, 6)

    def lin(kw, kb, fan_in, fan_out):
        bound = 1.0 / jnp.sqrt(jnp.float32(fan_in))
        w = jax.random.uniform(kw, (fan_in, fan_out), jnp.float32, -bound, bound)
        b = jax.random.uniform(kb, (1, fan_out), jnp.float32, -bound, bound)
        return w, b

    w1, b1 = lin(ks[0], ks[1], D_IN, D_H1)
    w2, b2 = lin(ks[2], ks[3], D_H1, D_H2)
    w3, b3 = lin(ks[4], ks[5], D_H2, D_OUT)
    return {"w1": w1, "b1": b1, "w2": w2, "b2": b2, "w3": w3, "b3": b3}


def reference_forward(x, p):
    h1 = jnp.maximum(x @ p["w1"] + p["b1"], 0.0)
    h2 = jnp.maximum(h1 @ p["w2"] + p["b2"], 0.0)
    return h2 @ p["w3"] + p["b3"]


if __name__ == "__main__":
    key = jax.random.PRNGKey(0)
    k_x, k_p = jax.random.split(key)
    params = init_params(k_p)

    # 1) Small batch, f32 MXU operands, single-tile path (padded to 128 rows).
    B = 8
    x = jax.random.normal(k_x, (B, D_IN), jnp.float32)
    out = jax.block_until_ready(car_rot_forward(x, params, use_bf16=False))
    ref = reference_forward(x, params)
    assert out.shape == (B, D_OUT)
    assert jnp.allclose(out, ref, atol=1e-5, rtol=1e-5)

    # 2) Multi-step grid with batch padding (B=300, tile_b=128 -> 3 steps), f32.
    B2 = 300
    x2 = jax.random.normal(k_x, (B2, D_IN), jnp.float32)
    out2 = jax.block_until_ready(
        car_rot_forward(x2, params, use_bf16=False, tile_b=128))
    ref2 = reference_forward(x2, params)
    assert out2.shape == (B2, D_OUT)
    assert jnp.allclose(out2, ref2, atol=1e-5, rtol=1e-5)

    # 3) Default path: bf16 MXU operands (native MXU dtype on v5e/v6e/v7x),
    #    f32 accumulation; relaxed tolerance vs the f32 reference.
    out3 = jax.block_until_ready(car_rot_forward(x2, params, tile_b=128))
    assert out3.shape == (B2, D_OUT)
    assert jnp.allclose(out3, ref2, atol=1e-1, rtol=1e-1)

    print("KERNEL_OK")
</pallas_src>

<mosaic_0001>
module attributes {stable_mosaic.version = 11 : i64} {
  func.func @_mlp_kernel(%arg0: i32, %arg1: memref<128x71xf32, #tpu.memory_space<vmem>>, %arg2: memref<71x52xf32, #tpu.memory_space<vmem>>, %arg3: memref<1x52xf32, #tpu.memory_space<vmem>>, %arg4: memref<52x29xf32, #tpu.memory_space<vmem>>, %arg5: memref<1x29xf32, #tpu.memory_space<vmem>>, %arg6: memref<6x29xf32, #tpu.memory_space<vmem>>, %arg7: memref<6x1xf32, #tpu.memory_space<vmem>>, %arg8: memref<6x128xf32, #tpu.memory_space<vmem>>) attributes {dimension_semantics = [#tpu.dimension_semantics<parallel>], iteration_bounds = array<i64: 1>, scalar_prefetch = 0 : i64, scratch_operands = 0 : i64, tpu.core_type = #tpu.core_type<tc>, window_params = [{transform_indices = @transform_0, window_bounds = array<i64: 128, 71>}, {pipeline_mode = #tpu.pipeline_mode<synchronous>, transform_indices = @transform_1, window_bounds = array<i64: 71, 52>}, {pipeline_mode = #tpu.pipeline_mode<synchronous>, transform_indices = @transform_2, window_bounds = array<i64: 1, 52>}, {pipeline_mode = #tpu.pipeline_mode<synchronous>, transform_indices = @transform_3, window_bounds = array<i64: 52, 29>}, {pipeline_mode = #tpu.pipeline_mode<synchronous>, transform_indices = @transform_4, window_bounds = array<i64: 1, 29>}, {pipeline_mode = #tpu.pipeline_mode<synchronous>, transform_indices = @transform_5, window_bounds = array<i64: 6, 29>}, {pipeline_mode = #tpu.pipeline_mode<synchronous>, transform_indices = @transform_6, window_bounds = array<i64: 6, 1>}, {transform_indices = @transform_7, window_bounds = array<i64: 6, 128>}]} {
    %c0 = arith.constant 0 : index
    %c0_0 = arith.constant 0 : index
    %0 = vector.load %arg1[%c0, %c0_0] : memref<128x71xf32, #tpu.memory_space<vmem>>, vector<128x71xf32>
    %c0_1 = arith.constant 0 : index
    %c0_2 = arith.constant 0 : index
    %1 = vector.load %arg2[%c0_1, %c0_2] : memref<71x52xf32, #tpu.memory_space<vmem>>, vector<71x52xf32>
    %cst = arith.constant dense<0.000000e+00> : vector<128x52xf32>
    %2 = tpu.matmul %0, %1, %cst {dimension_numbers = #tpu.dot_dimension_numbers<[1], [0], [0], [1], [0, 0, 1, 1], [], []>} : vector<128x71xf32>, vector<71x52xf32>, vector<128x52xf32> -> vector<128x52xf32>
    %c0_3 = arith.constant 0 : index
    %c0_4 = arith.constant 0 : index
    %3 = vector.load %arg3[%c0_3, %c0_4] : memref<1x52xf32, #tpu.memory_space<vmem>>, vector<1x52xf32>
    %4 = vector.broadcast %3 : vector<1x52xf32> to vector<128x52xf32>
    %5 = arith.addf %2, %4 : vector<128x52xf32>
    %cst_5 = arith.constant 0.000000e+00 : f32
    %6 = vector.broadcast %cst_5 : f32 to vector<128x52xf32>
    %7 = arith.maximumf %5, %6 : vector<128x52xf32>
    %c0_6 = arith.constant 0 : index
    %c0_7 = arith.constant 0 : index
    %8 = vector.load %arg4[%c0_6, %c0_7] : memref<52x29xf32, #tpu.memory_space<vmem>>, vector<52x29xf32>
    %cst_8 = arith.constant dense<0.000000e+00> : vector<128x29xf32>
    %9 = tpu.matmul %7, %8, %cst_8 {dimension_numbers = #tpu.dot_dimension_numbers<[1], [0], [0], [1], [0, 0, 1, 1], [], []>} : vector<128x52xf32>, vector<52x29xf32>, vector<128x29xf32> -> vector<128x29xf32>
    %c0_9 = arith.constant 0 : index
    %c0_10 = arith.constant 0 : index
    %10 = vector.load %arg5[%c0_9, %c0_10] : memref<1x29xf32, #tpu.memory_space<vmem>>, vector<1x29xf32>
    %11 = vector.broadcast %10 : vector<1x29xf32> to vector<128x29xf32>
    %12 = arith.addf %9, %11 : vector<128x29xf32>
    %cst_11 = arith.constant 0.000000e+00 : f32
    %13 = vector.broadcast %cst_11 : f32 to vector<128x29xf32>
    %14 = arith.maximumf %12, %13 : vector<128x29xf32>
    %c0_12 = arith.constant 0 : index
    %c0_13 = arith.constant 0 : index
    %15 = vector.load %arg6[%c0_12, %c0_13] : memref<6x29xf32, #tpu.memory_space<vmem>>, vector<6x29xf32>
    %cst_14 = arith.constant dense<0.000000e+00> : vector<6x128xf32>
    %16 = tpu.matmul %15, %14, %cst_14 {dimension_numbers = #tpu.dot_dimension_numbers<[1], [1], [0], [0], [0, 0, 1, 0], [], []>} : vector<6x29xf32>, vector<128x29xf32>, vector<6x128xf32> -> vector<6x128xf32>
    %c0_15 = arith.constant 0 : index
    %c0_16 = arith.constant 0 : index
    %17 = vector.load %arg7[%c0_15, %c0_16] : memref<6x1xf32, #tpu.memory_space<vmem>>, vector<6x1xf32>
    %18 = vector.broadcast %17 : vector<6x1xf32> to vector<6x128xf32>
    %19 = arith.addf %16, %18 : vector<6x128xf32>
    %c0_17 = arith.constant 0 : index
    %c0_18 = arith.constant 0 : index
    %20 = vector.load %arg8[%c0_17, %c0_18] : memref<6x128xf32, #tpu.memory_space<vmem>>, vector<6x128xf32>
    tpu.vector_store %arg8[%c0_17, %c0_18], %19 {strides = array<i32>} : memref<6x128xf32, #tpu.memory_space<vmem>>, vector<6x128xf32>,
    return
  }
  func.func @transform_0(%arg0: i32) -> (i32, i32) {
    %c0_i32 = arith.constant 0 : i32
    %c0_i32_0 = arith.constant 0 : i32
    return %arg0, %c0_i32 : i32, i32
  }
  func.func @transform_1(%arg0: i32) -> (i32, i32) {
    %c0_i32 = arith.constant 0 : i32
    %c0_i32_0 = arith.constant 0 : i32
    %c0_i32_1 = arith.constant 0 : i32
    return %c0_i32, %c0_i32_0 : i32, i32
  }
  func.func @transform_2(%arg0: i32) -> (i32, i32) {
    %c0_i32 = arith.constant 0 : i32
    %c0_i32_0 = arith.constant 0 : i32
    %c0_i32_1 = arith.constant 0 : i32
    return %c0_i32, %c0_i32_0 : i32, i32
  }
  func.func @transform_3(%arg0: i32) -> (i32, i32) {
    %c0_i32 = arith.constant 0 : i32
    %c0_i32_0 = arith.constant 0 : i32
    %c0_i32_1 = arith.constant 0 : i32
    return %c0_i32, %c0_i32_0 : i32, i32
  }
  func.func @transform_4(%arg0: i32) -> (i32, i32) {
    %c0_i32 = arith.constant 0 : i32
    %c0_i32_0 = arith.constant 0 : i32
    %c0_i32_1 = arith.constant 0 : i32
    return %c0_i32, %c0_i32_0 : i32, i32
  }
  func.func @transform_5(%arg0: i32) -> (i32, i32) {
    %c0_i32 = arith.constant 0 : i32
    %c0_i32_0 = arith.constant 0 : i32
    %c0_i32_1 = arith.constant 0 : i32
    return %c0_i32, %c0_i32_0 : i32, i32
  }
  func.func @transform_6(%arg0: i32) -> (i32, i32) {
    %c0_i32 = arith.constant 0 : i32
    %c0_i32_0 = arith.constant 0 : i32
    %c0_i32_1 = arith.constant 0 : i32
    return %c0_i32, %c0_i32_0 : i32, i32
  }
  func.func @transform_7(%arg0: i32) -> (i32, i32) {
    %c0_i32 = arith.constant 0 : i32
    %c0_i32_0 = arith.constant 0 : i32
    return %c0_i32, %arg0 : i32, i32
  }
}

</mosaic_0001>

<bundles_post_ra>
// kernel: car_rot_forward.1
= control target key start
LH: loop header
LB: loop body
LE: loop exit
PB: predicated region body
PF: predicated region fallthrough
CT: control target
= control target key end

     0   :  { %12 = vsyncpa [#allocation3], 0  ;;  %s1466_s0 = inlined_call_operand.hbm [shape: f32[128,71], index: 0, kind: input, shape index: {}]   ;;  %s1467_s1 = inlined_call_operand.hbm [shape: f32[71,52], index: 1, kind: input, shape index: {}]   ;;  %s1468_s2 = inlined_call_operand.hbm [shape: f32[1,52], index: 2, kind: input, shape index: {}]   ;;  %s1469_s3 = inlined_call_operand.hbm [shape: f32[52,29], index: 3, kind: input, shape index: {}]   ;;  %s1470_s4 = inlined_call_operand.hbm [shape: f32[1,29], index: 4, kind: input, shape index: {}]   ;;  %s1471_s5 = inlined_call_operand.hbm [shape: f32[6,29], index: 5, kind: input, shape index: {}]   ;;  %s1472_s6 = inlined_call_operand.hbm [shape: f32[6,1], index: 6, kind: input, shape index: {}]   ;;  %s1473_s7 = inlined_call_operand.hbm [shape: f32[6,128], index: 7, kind: output, shape index: {}]  }
   0x1   :  { %13 = vsyncpa [#allocation6], 0 }
   0x2   :  { %14 = vsyncpa [#allocation9], 0 }
   0x3   :  { %15 = vsyncpa [#allocation12], 0 }
   0x4   :  { %16 = vsyncpa [#allocation4], 0  ;;  %s1230_s24 = smov [#allocation5]   ;;  %s1231_s26 = smov [#allocation8]  }
   0x5   :  { %s34_s25 = sshll.u32 %s1230_s24, 4  ;;  %s56_s27 = sshll.u32 %s1231_s26, 4  ;;  %s35_s25 = int_to_ptr.vmem [resolvable:$true] %s34_s25  ;;  %s1284_s27 = int_to_ptr.vmem [resolvable:$true] %s56_s27 }
   0x6   :  { %s1044_s30 = scalar_lea.hbm %s1467_s1, 1152 }
   0x7   :  { %p1045_p0 = scmp.ne.s32.totalorder %s1467_s1, %s1044_s30  ;;  %p1048_p1 = scmp.lt.u32.totalorder %s1044_s30, %s1467_s1 }
   0x9   :  { %p1050_p2 = pnand %p1048_p1, %p1045_p0 }
   0xb   :  { %1053 = shalt.err (!%p1050_p2)
}
   0xc   :  { %s1054_s12 = scalar_lea.vmem %s35_s25, 1152  ;;  %p1059_p4 = scmp.lt.s32.totalorder %s35_s25, %s35_s25 }
   0xd   :  { %p1055_p3 = scmp.ne.s32.totalorder %s35_s25, %s1054_s12  ;;  %p1060_p5 = scmp.lt.s32.totalorder %s1054_s12, %s1054_s12 }
   0xf   :  { %p1061_p6 = por %p1060_p5, %p1059_p4 }
  0x11   :  { %p1062_p7 = pnand %p1061_p6, %p1055_p3 }
  0x13   :  { %1065 = shalt.err (!%p1062_p7)
}
  0x14   :  { %s1232_s13 = smov 128   ;;  %s1233_s14 = smov 8  }
  0x15   :  { %40 = dma.hbm_to_vmem [thread:$0]  %s1467_s1, 1152, %s35_s25, [#allocation6], %s1232_s13, %s1232_s13, %s1233_s14  }
  0x16   :  { %s1066_s19 = scalar_lea.hbm %s1469_s3, 896 }
  0x17   :  { %p1067_p8 = scmp.ne.s32.totalorder %s1469_s3, %s1066_s19  ;;  %p1070_p9 = scmp.lt.u32.totalorder %s1066_s19, %s1469_s3 }
  0x19   :  { %p1072_p10 = pnand %p1070_p9, %p1067_p8 }
  0x1b   :  { %1075 = shalt.err (!%p1072_p10)
}
  0x1c   :  { %s1076_s24 = scalar_lea.vmem %s1284_s27, 896  ;;  %p1081_p12 = scmp.lt.s32.totalorder %s1284_s27, %s1284_s27 }
  0x1d   :  { %p1077_p11 = scmp.ne.s32.totalorder %s1284_s27, %s1076_s24  ;;  %p1082_p13 = scmp.lt.s32.totalorder %s1076_s24, %s1076_s24 }
  0x1f   :  { %p1083_p0 = por %p1082_p13, %p1081_p12 }
  0x21   :  { %p1084_p1 = pnand %p1083_p0, %p1077_p11 }
  0x23   :  { %1087 = shalt.err (!%p1084_p1)
}
  0x24   :  { %62 = dma.hbm_to_vmem [thread:$0]  %s1469_s3, 896, %s1284_s27, [#allocation9], %s1232_s13, %s1232_s13, %s1233_s14  }
  0x25   :  { %s1234_s26 = smov [#allocation11]   ;;  %s1235_s29 = smov [#allocation2]  }
  0x26   :  { %s79_s28 = sshll.u32 %s1234_s26, 4  ;;  %s22_s30 = sshll.u32 %s1235_s29, 4  ;;  %s80_s28 = int_to_ptr.vmem [resolvable:$true] %s79_s28  ;;  %s1321_s30 = int_to_ptr.vmem [resolvable:$true] %s22_s30 }
  0x27   :  { %s1088_s10 = scalar_lea.hbm %s1471_s5, 128 }
  0x28   :  { %p1089_p2 = scmp.ne.s32.totalorder %s1471_s5, %s1088_s10  ;;  %p1092_p3 = scmp.lt.u32.totalorder %s1088_s10, %s1471_s5 }
  0x2a   :  { %p1094_p4 = pnand %p1092_p3, %p1089_p2 }
  0x2c   :  { %1097 = shalt.err (!%p1094_p4)
}
  0x2d   :  { %s1098_s3 = scalar_lea.vmem %s80_s28, 128  ;;  %p1103_p6 = scmp.lt.s32.totalorder %s80_s28, %s80_s28 }
  0x2e   :  { %p1099_p5 = scmp.ne.s32.totalorder %s80_s28, %s1098_s3  ;;  %p1104_p7 = scmp.lt.s32.totalorder %s1098_s3, %s1098_s3 }
  0x30   :  { %p1105_p8 = por %p1104_p7, %p1103_p6 }
  0x32   :  { %p1106_p9 = pnand %p1105_p8, %p1099_p5 }
  0x34   :  { %1109 = shalt.err (!%p1106_p9)
}
  0x35   :  { %82 = dma.hbm_to_vmem [thread:$0]  %s1471_s5, 128, %s80_s28, [#allocation12]  }
  0x36   :  { %s1110_s20 = scalar_lea.hbm %s1466_s0, 2048 }
  0x37   :  { %p1111_p10 = scmp.ne.s32.totalorder %s1466_s0, %s1110_s20  ;;  %p1114_p11 = scmp.lt.u32.totalorder %s1110_s20, %s1466_s0 }
  0x39   :  { %p1116_p12 = pnand %p1114_p11, %p1111_p10 }
  0x3b   :  { %1119 = shalt.err (!%p1116_p12)
}
  0x3c   :  { %s1120_s1 = scalar_lea.vmem %s1321_s30, 2048  ;;  %p1125_p0 = scmp.lt.s32.totalorder %s1321_s30, %s1321_s30 }
  0x3d   :  { %p1121_p13 = scmp.ne.s32.totalorder %s1321_s30, %s1120_s1  ;;  %p1126_p1 = scmp.lt.s32.totalorder %s1120_s1, %s1120_s1 }
  0x3f   :  { %p1127_p2 = por %p1126_p1, %p1125_p0 }
  0x41   :  { %p1128_p3 = pnand %p1127_p2, %p1121_p13 }
  0x43   :  { %1131 = shalt.err (!%p1128_p3)
}
  0x44   :  { %28 = dma.hbm_to_vmem [thread:$0]  %s1466_s0, 2048, %s1321_s30, [#allocation3], %s1232_s13, %s1232_s13, %s1233_s14  }
  0x45   :  { %s1236_s26 = smov [#allocation7]   ;;  %s1237_s29 = smov [#allocation10]  }
  0x46   :  { %s47_s28 = sshll.u32 %s1236_s26, 4  ;;  %s69_s8 = sshll.u32 %s1237_s29, 4  ;;  %s48_s28 = int_to_ptr.vmem [resolvable:$true] %s47_s28  ;;  %s70_s8 = int_to_ptr.vmem [resolvable:$true] %s69_s8 }
  0x47   :  { %s1132_s11 = scalar_lea.hbm %s1468_s2, 16 }
  0x48   :  { %p1133_p4 = scmp.ne.s32.totalorder %s1468_s2, %s1132_s11  ;;  %p1136_p5 = scmp.lt.u32.totalorder %s1132_s11, %s1468_s2 }
  0x4a   :  { %p1138_p6 = pnand %p1136_p5, %p1133_p4 }
  0x4c   :  { %1141 = shalt.err (!%p1138_p6)
}
  0x4d   :  { %s1142_s0 = scalar_lea.vmem %s48_s28, 16  ;;  %s1146_s13 = scalar_lea.vmem %s48_s28, 32 }
  0x4e   :  { %p1143_p7 = scmp.ne.s32.totalorder %s48_s28, %s1142_s0  ;;  %p1147_p8 = scmp.lt.s32.totalorder %s48_s28, %s48_s28 }
  0x4f   :  { %p1148_p9 = scmp.lt.s32.totalorder %s1146_s13, %s1142_s0 }
  0x51   :  { %p1149_p10 = por %p1148_p9, %p1147_p8 }
  0x53   :  { %p1150_p11 = pnand %p1149_p10, %p1143_p7 }
  0x55   :  { %1153 = shalt.err (!%p1150_p11)
}
  0x56   :  { %50 = dma.hbm_to_vmem [thread:$0]  %s1468_s2, 16, %s48_s28, [#allocation6]  }
  0x57   :  { %s1154_s18 = scalar_lea.hbm %s1470_s4, 16 }
  0x58   :  { %p1155_p12 = scmp.ne.s32.totalorder %s1470_s4, %s1154_s18  ;;  %p1158_p13 = scmp.lt.u32.totalorder %s1154_s18, %s1470_s4 }
  0x5a   :  { %p1160_p0 = pnand %p1158_p13, %p1155_p12 }
  0x5c   :  { %1163 = shalt.err (!%p1160_p0)
}
  0x5d   :  { %s1164_s23 = scalar_lea.vmem %s70_s8, 16  ;;  %s1168_s24 = scalar_lea.vmem %s70_s8, 32 }
  0x5e   :  { %p1165_p1 = scmp.ne.s32.totalorder %s70_s8, %s1164_s23  ;;  %p1169_p2 = scmp.lt.s32.totalorder %s70_s8, %s70_s8 }
  0x5f   :  { %p1170_p3 = scmp.lt.s32.totalorder %s1168_s24, %s1164_s23 }
  0x61   :  { %p1171_p4 = por %p1170_p3, %p1169_p2 }
  0x63   :  { %p1172_p5 = pnand %p1171_p4, %p1165_p1 }
  0x65   :  { %1175 = shalt.err (!%p1172_p5)
}
  0x66   :  { %72 = dma.hbm_to_vmem [thread:$0]  %s1470_s4, 16, %s70_s8, [#allocation9]  }
  0x67   :  { %s1238_s5 = smov [#allocation13]   ;;  %s1176_s29 = scalar_lea.hbm %s1472_s6, 128 }
  0x68   :  { %s89_s25 = sshll.u32 %s1238_s5, 4  ;;  %p1177_p6 = scmp.ne.s32.totalorder %s1472_s6, %s1176_s29  ;;  %s90_s25 = int_to_ptr.vmem [resolvable:$true] %s89_s25 }
  0x69   :  { %p1180_p7 = scmp.lt.u32.totalorder %s1176_s29, %s1472_s6 }
  0x6b   :  { %p1182_p8 = pnand %p1180_p7, %p1177_p6 }
  0x6d   :  { %1185 = shalt.err (!%p1182_p8)
}
  0x6e   :  { %s1186_s15 = scalar_lea.vmem %s90_s25, 128  ;;  %p1191_p10 = scmp.lt.s32.totalorder %s90_s25, %s90_s25 }
  0x6f   :  { %p1187_p9 = scmp.ne.s32.totalorder %s90_s25, %s1186_s15  ;;  %p1192_p11 = scmp.lt.s32.totalorder %s1186_s15, %s1186_s15 }
  0x71   :  { %p1193_p12 = por %p1192_p11, %p1191_p10 }
  0x73   :  { %p1194_p13 = pnand %p1193_p12, %p1187_p9 }
  0x75   :  { %1197 = shalt.err (!%p1194_p13)
}
  0x76   :  { %92 = dma.hbm_to_vmem [thread:$0]  %s1472_s6, 128, %s90_s25, [#allocation12]  }
  0x77   :  { %1220 = dma.done.wait [#allocation3], 2048  }
  0x78   :  { %1221 = vsyncadd [#allocation3], 4294965248 }
  0x79   :  { %1222 = dma.done.wait [#allocation6], 1168  }
  0x7a   :  { %1223 = vsyncadd [#allocation6], 4294966128 }
  0x7b   :  { %1224 = dma.done.wait [#allocation9], 912  }
  0x7c   :  { %1225 = vsyncadd [#allocation9], 4294966384 }
  0x7d   :  { %1226 = dma.done.wait [#allocation12], 256  }
  0x7e   :  { %1227 = vsyncadd [#allocation12], 4294967040  ;;  %v130_v0 = vld [vmem:[#allocation5] sm:$0xff]  ;;  %v131_v1 = vld [vmem:[#allocation5 + $0x8] sm:$0xff]  ;;  %vm146_vm0 = vcmask 580608   ;;  %vm195_vm1 = vcmask 1046528  }
  0x7f   :  { %v132_v2 = vld [vmem:[#allocation5 + $0x10] sm:$0xff]  ;;  %v969_v3 = vpack.c.bf16 %v131_v1, %v130_v0  ;;  %v133_v4 = vld [vmem:[#allocation5 + $0x18] sm:$0xff]  ;;  %v134_v6 = vld [vmem:[#allocation5 + $0x20] sm:$0xff]  ;;  %vm423_vm2 = vcmask 1043456   ;;  %vm374_vm3 = vcmask 424960   ;;  %vm1240_vm4 = vmmov 0  }
  0x80   :  { %v973_v5 = vpack.c.bf16 %v133_v4, %v132_v2  ;;  %v135_v7 = vld [vmem:[#allocation5 + $0x28] sm:$0xff]  ;;  %v114_v8 = vld [vmem:[#allocation2] sm:$0xff]  ;;  %v136_v10 = vld [vmem:[#allocation5 + $0x30] sm:$0xff]  ;;  %vm595_vm5 = vcmask 236544   ;;  %s1243_s6 = smov [#allocation14]  }
  0x81   :  { %970 = vmatprep.subr.bf16.mxu0 %v969_v3  ;;  %872 = vmatprep.mubr.msk.f32.mxu0 %vm146_vm0, %v114_v8  ;;  %v977_v9 = vpack.c.bf16 %v135_v7, %v134_v6  ;;  %v137_v11 = vld [vmem:[#allocation5 + $0x38] sm:$0xff]  ;;  %v360_v12 = vld [vmem:[#allocation8] sm:$0xff]  ;;  %v363_v17 = vld [vmem:[#allocation8 + $0x18] sm:$0xff]  ;;  %s724_s16 = sshll.u32 %s1243_s6, 4  ;;  %s725_s16 = int_to_ptr.vmem [resolvable:$true] %s724_s16 }
  0x82   :  { %972 = vmatpush3.bf16.msra.mxu0 %v969_v3  ;;  %v361_v13 = vld [vmem:[#allocation8 + $0x8] sm:$0xff]  ;;  %v981_v14 = vpack.c.bf16 %v137_v11, %v136_v10  ;;  %v362_v16 = vld [vmem:[#allocation8 + $0x10] sm:$0xff]  ;;  %v115_v20 = vld [vmem:[#allocation2 + $0x8] sm:$0xff]  ;;  %s1198_s3 = scalar_lea.vmem %s725_s16, 128  ;;  %p1203_p1 = scmp.lt.s32.totalorder %s725_s16, %s725_s16 }
  0x83   :  { %974 = vmatprep.subr.bf16.mxu0 %v973_v5  ;;  %v985_v15 = vpack.c.bf16 %v361_v13, %v360_v12  ;;  %v989_v18 = vpack.c.bf16 %v363_v17, %v362_v16  ;;  %v138_v19 = vld [vmem:[#allocation5 + $0x40] sm:$0x7f]  ;;  %v116_v21 = vld [vmem:[#allocation2 + $0x10] sm:$0xff]  ;;  %v117_v22 = vld [vmem:[#allocation2 + $0x18] sm:$0xff]  ;;  %p1199_p0 = scmp.ne.s32.totalorder %s725_s16, %s1198_s3  ;;  %p1204_p2 = scmp.lt.s32.totalorder %s1198_s3, %s1198_s3 }
  0x84   :  { %v118_v23 = vld [vmem:[#allocation2 + $0x20] sm:$0xff]  ;;  %v119_v24 = vld [vmem:[#allocation2 + $0x28] sm:$0xff]  ;;  %v120_v25 = vld [vmem:[#allocation2 + $0x30] sm:$0xff] }
  0x85   :  { %986 = vmatprep.subr.bf16.mxu1 %v985_v15  ;;  %v121_v26 = vld [vmem:[#allocation2 + $0x38] sm:$0xff]  ;;  %v122_v27 = vld [vmem:[#allocation2 + $0x40] sm:$0xff]  ;;  %v123_v28 = vld [vmem:[#allocation2 + $0x48] sm:$0xff]  ;;  %p1205_p3 = por %p1204_p2, %p1203_p1 }
  0x86   :  { %976 = vmatpush3.bf16.msra.mxu0 %v973_v5  ;;  %988 = vmatpush3.bf16.msra.mxu1 %v985_v15  ;;  %v124_v29 = vld [vmem:[#allocation2 + $0x50] sm:$0xff]  ;;  %v125_v30 = vld [vmem:[#allocation2 + $0x58] sm:$0xff]  ;;  %v126_v31 = vld [vmem:[#allocation2 + $0x60] sm:$0xff] }
  0x87   :  { %978 = vmatprep.subr.bf16.mxu0 %v977_v9  ;;  %990 = vmatprep.subr.bf16.mxu1 %v989_v18  ;;  %v127_v32 = vld [vmem:[#allocation2 + $0x68] sm:$0xff]  ;;  %v128_v33 = vld [vmem:[#allocation2 + $0x70] sm:$0xff]  ;;  %v129_v34 = vld [vmem:[#allocation2 + $0x78] sm:$0xff]  ;;  %p1206_p4 = pnand %p1205_p3, %p1199_p0 }
  0x88   :  { %v364_v35 = vld [vmem:[#allocation8 + $0x20] sm:$0xff]  ;;  %v365_v36 = vld [vmem:[#allocation8 + $0x28] sm:$0xff]  ;;  %v366_v38 = vld [vmem:[#allocation8 + $0x30] sm:$0xf] }
  0x89   :  { %v993_v37 = vpack.c.bf16 %v365_v36, %v364_v35  ;;  %v736_v39 = vld [vmem:[#allocation7] ss:$0 sm:$0xff]  ;;  %vm1426_vm6 = vmpackc.low %vm595_vm5, %vm595_vm5 }
  0x8a   :  { %980 = vmatpush3.bf16.msra.mxu0 %v977_v9  ;;  %992 = vmatpush3.bf16.msra.mxu1 %v989_v18 }
  0x8b   :  { %982 = vmatprep.subr.bf16.mxu0 %v981_v14  ;;  %994 = vmatprep.subr.bf16.mxu1 %v993_v37 }
  0x8e   :  { %984 = vmatpush3.bf16.msra.mxu0 %v981_v14  ;;  %996 = vmatpush3.bf16.msra.mxu1 %v993_v37 }
  0x8f   :  { %870 = vmatprep.subr.msk.mxu0 %vm195_vm1, %v138_v19  ;;  %908 = vmatprep.subr.msk.mxu1 %vm423_vm2, %v366_v38 }
  0x92   :  { %871 = vmatpush3.msk.msra.mxu0 %vm195_vm1, %v138_v19  ;;  %909 = vmatpush3.msk.msra.mxu1 %vm423_vm2, %v366_v38 }
  0x93   :  { %873 = vmatmul.mubr.msk.f32.vlgmr.msra.gmra.mrb[0].mxu0 %vm146_vm0, %v115_v20 }
  0x94   :  { %875 = vmatprep.mubr.msk.f32.mxu0 %vm146_vm0, %v116_v21 }
  0x97   :  { %876 = vmatmul.mubr.msk.f32.gmra.mrb[2].mxu0 %vm146_vm0, %v117_v22 }
  0x98   :  { %878 = vmatprep.mubr.msk.f32.mxu0 %vm146_vm0, %v118_v23 }
  0x9b   :  { %879 = vmatmul.mubr.msk.f32.gmra.mrb[4].mxu0 %vm146_vm0, %v119_v24  ;;  %v1239_v24 = vmov 0.0|0.0  }
  0x9c   :  { %881 = vmatprep.mubr.msk.f32.mxu0 %vm146_vm0, %v120_v25  ;;  %997 = vmatprep.subr.bf16.mxu1 %v1239_v24  ;;  %v1241_v25 = vmov 0.0  }
  0x9f   :  { %882 = vmatmul.mubr.msk.f32.gmra.mrb[6].mxu0 %vm146_vm0, %v121_v26  ;;  %v589_v26 = vld [vmem:[#allocation13] sm:$0x3f] }
  0xa0   :  { %884 = vmatprep.mubr.msk.f32.mxu0 %vm146_vm0, %v122_v27  ;;  %v1242_v27 = vmov 0  }
  0xa1   :  { %1043 = vset.pattern.permute.xlu0 %v1242_v27 }
  0xa2   :  { %592 = vperm.xlu0 %1043, %v589_v26  }
  0xa3   :  { %885 = vmatmul.mubr.msk.f32.gmra.mrb[8].mxu0 %vm146_vm0, %v123_v28  ;;  %v754_v28 = vld [vmem:[#allocation10] ss:$0 sm:$0xff] }
  0xa4   :  { %887 = vmatprep.mubr.msk.f32.mxu0 %vm146_vm0, %v124_v29 }
  0xa7   :  { %888 = vmatmul.mubr.msk.f32.gmra.mrb[10].mxu0 %vm146_vm0, %v125_v30 }
  0xa8   :  { %890 = vmatprep.mubr.msk.f32.mxu0 %vm146_vm0, %v126_v31 }
  0xab   :  { %891 = vmatmul.mubr.msk.f32.gmra.mrb[12].mxu0 %vm146_vm0, %v127_v32 }
  0xac   :  { %893 = vmatprep.mubr.msk.f32.mxu0 %vm146_vm0, %v128_v33 }
  0xaf   :  { %894 = vmatmul.mubr.msk.f32.gmra.mrb[14].mxu0 %vm146_vm0, %v129_v34 }
 0x166   :  { %v874_v40 = vpop.f32.mrb[0].mxu0 }
 0x167   :  { %v271_v41 = vadd.f32 %v874_v40, %v736_v39  ;;  %v265_v42 = vpop.f32.mrb[1].mxu0 }
 0x168   :  { %v266_v43 = vadd.f32 %v736_v39, %v265_v42 }
 0x169   :  { %v345_v46 = vmax.f32 %v271_v41, 0.0 }
 0x16a   :  { %v344_v44 = vmax.f32 %v266_v43, 0.0  ;;  %v877_v45 = vpop.f32.mrb[2].mxu0 }
 0x16b   :  { %v281_v47 = vadd.f32 %v877_v45, %v736_v39  ;;  %v275_v48 = vpop.f32.mrb[3].mxu0 }
 0x16c   :  { %v276_v49 = vadd.f32 %v736_v39, %v275_v48  ;;  %910 = vmatprep.mubr.msk.f32.mxu1 %vm374_vm3, %v344_v44 }
 0x16d   :  { %v347_v50 = vmax.f32 %v281_v47, 0.0  ;;  %911 = vmatmul.mubr.msk.f32.vlgmr.msra.gmra.mrb[0].mxu1 %vm374_vm3, %v345_v46 }
 0x16e   :  { %v346_v51 = vmax.f32 %v276_v49, 0.0  ;;  %v880_v52 = vpop.f32.mrb[4].mxu0 }
 0x16f   :  { %v291_v53 = vadd.f32 %v880_v52, %v736_v39  ;;  %v285_v54 = vpop.f32.mrb[5].mxu0 }
 0x170   :  { %913 = vmatprep.mubr.msk.f32.mxu1 %vm374_vm3, %v346_v51  ;;  %v286_v55 = vadd.f32 %v736_v39, %v285_v54 }
 0x171   :  { %914 = vmatmul.mubr.msk.f32.gmra.mrb[2].mxu1 %vm374_vm3, %v347_v50  ;;  %v349_v56 = vmax.f32 %v291_v53, 0.0 }
 0x172   :  { %v348_v57 = vmax.f32 %v286_v55, 0.0  ;;  %v883_v58 = vpop.f32.mrb[6].mxu0 }
 0x173   :  { %v301_v59 = vadd.f32 %v883_v58, %v736_v39  ;;  %v295_v60 = vpop.f32.mrb[7].mxu0 }
 0x174   :  { %916 = vmatprep.mubr.msk.f32.mxu1 %vm374_vm3, %v348_v57  ;;  %v296_v61 = vadd.f32 %v736_v39, %v295_v60 }
 0x175   :  { %917 = vmatmul.mubr.msk.f32.gmra.mrb[4].mxu1 %vm374_vm3, %v349_v56  ;;  %v351_v62 = vmax.f32 %v301_v59, 0.0 }
 0x176   :  { %v350_v63 = vmax.f32 %v296_v61, 0.0  ;;  %v886_v0 = vpop.f32.mrb[8].mxu0 }
 0x177   :  { %v311_v1 = vadd.f32 %v886_v0, %v736_v39  ;;  %v305_v2 = vpop.f32.mrb[9].mxu0 }
 0x178   :  { %919 = vmatprep.mubr.msk.f32.mxu1 %vm374_vm3, %v350_v63  ;;  %v306_v3 = vadd.f32 %v736_v39, %v305_v2 }
 0x179   :  { %920 = vmatmul.mubr.msk.f32.gmra.mrb[6].mxu1 %vm374_vm3, %v351_v62  ;;  %v353_v4 = vmax.f32 %v311_v1, 0.0 }
 0x17a   :  { %v352_v5 = vmax.f32 %v306_v3, 0.0  ;;  %v889_v6 = vpop.f32.mrb[10].mxu0 }
 0x17b   :  { %v321_v7 = vadd.f32 %v889_v6, %v736_v39  ;;  %v315_v8 = vpop.f32.mrb[11].mxu0 }
 0x17c   :  { %922 = vmatprep.mubr.msk.f32.mxu1 %vm374_vm3, %v352_v5  ;;  %v316_v9 = vadd.f32 %v736_v39, %v315_v8 }
 0x17d   :  { %923 = vmatmul.mubr.msk.f32.gmra.mrb[8].mxu1 %vm374_vm3, %v353_v4  ;;  %v355_v10 = vmax.f32 %v321_v7, 0.0 }
 0x17e   :  { %v354_v11 = vmax.f32 %v316_v9, 0.0  ;;  %v892_v12 = vpop.f32.mrb[12].mxu0 }
 0x17f   :  { %v331_v13 = vadd.f32 %v892_v12, %v736_v39  ;;  %v325_v14 = vpop.f32.mrb[13].mxu0 }
 0x180   :  { %925 = vmatprep.mubr.msk.f32.mxu1 %vm374_vm3, %v354_v11  ;;  %v326_v15 = vadd.f32 %v736_v39, %v325_v14 }
 0x181   :  { %926 = vmatmul.mubr.msk.f32.gmra.mrb[10].mxu1 %vm374_vm3, %v355_v10  ;;  %v357_v16 = vmax.f32 %v331_v13, 0.0 }
 0x182   :  { %v356_v17 = vmax.f32 %v326_v15, 0.0  ;;  %v895_v18 = vpop.f32.mrb[14].mxu0 }
 0x183   :  { %v341_v19 = vadd.f32 %v895_v18, %v736_v39  ;;  %v335_v20 = vpop.f32.mrb[15].mxu0 }
 0x184   :  { %928 = vmatprep.mubr.msk.f32.mxu1 %vm374_vm3, %v356_v17  ;;  %v336_v21 = vadd.f32 %v736_v39, %v335_v20 }
 0x185   :  { %929 = vmatmul.mubr.msk.f32.gmra.mrb[12].mxu1 %vm374_vm3, %v357_v16  ;;  %v359_v22 = vmax.f32 %v341_v19, 0.0 }
 0x186   :  { %v358_v23 = vmax.f32 %v336_v21, 0.0 }
 0x188   :  { %931 = vmatprep.mubr.msk.f32.mxu1 %vm374_vm3, %v358_v23  ;;  %v593_v23 = vpop.permute.xlu0 %592 }
 0x189   :  { %932 = vmatmul.mubr.msk.f32.gmra.mrb[14].mxu1 %vm374_vm3, %v359_v22  ;;  %v588_v22 = vld [vmem:[#allocation11] sm:$0x3f] }
 0x18a   :  { %966 = vmatprep.mubr.msk.f32.mxu1 %vm1240_vm4, %v1241_v25 }
 0x240   :  { %v912_v29 = vpop.f32.mrb[0].mxu1 }
 0x241   :  { %v499_v30 = vadd.f32 %v912_v29, %v754_v28  ;;  %v493_v31 = vpop.f32.mrb[1].mxu1 }
 0x242   :  { %v494_v32 = vadd.f32 %v754_v28, %v493_v31 }
 0x243   :  { %v573_v33 = vmax.f32 %v499_v30, 0.0 }
 0x244   :  { %v572_v34 = vmax.f32 %v494_v32, 0.0  ;;  %v915_v35 = vpop.f32.mrb[2].mxu1 }
 0x245   :  { %v509_v36 = vadd.f32 %v915_v35, %v754_v28  ;;  %v503_v37 = vpop.f32.mrb[3].mxu1 }
 0x246   :  { %v998_v39 = vpack.c.bf16 %v573_v33, %v572_v34  ;;  %v504_v40 = vadd.f32 %v754_v28, %v503_v37 }
 0x247   :  { %v575_v41 = vmax.f32 %v509_v36, 0.0 }
 0x248   :  { %v574_v42 = vmax.f32 %v504_v40, 0.0  ;;  %1000 = vmatpush3.bf16.xpose.msk.msra.mxu1 %vm1426_vm6, %v998_v39  ;;  %v918_v43 = vpop.f32.mrb[4].mxu1 }
 0x249   :  { %v519_v44 = vadd.f32 %v918_v43, %v754_v28  ;;  %v513_v45 = vpop.f32.mrb[5].mxu1  ;;  %1001 = vmatprep.subr.bf16.mxu1 %v1239_v24 }
 0x24a   :  { %v1002_v46 = vpack.c.bf16 %v575_v41, %v574_v42  ;;  %v514_v47 = vadd.f32 %v754_v28, %v513_v45 }
 0x24b   :  { %v577_v48 = vmax.f32 %v519_v44, 0.0 }
 0x24c   :  { %v576_v49 = vmax.f32 %v514_v47, 0.0  ;;  %v921_v50 = vpop.f32.mrb[6].mxu1 }
 0x24d   :  { %v529_v51 = vadd.f32 %v921_v50, %v754_v28  ;;  %v523_v52 = vpop.f32.mrb[7].mxu1 }
 0x24e   :  { %v1006_v53 = vpack.c.bf16 %v577_v48, %v576_v49  ;;  %v524_v54 = vadd.f32 %v754_v28, %v523_v52 }
 0x24f   :  { %v579_v55 = vmax.f32 %v529_v51, 0.0 }
 0x250   :  { %1004 = vmatpush3.bf16.xpose.msk.msra.mxu1 %vm1426_vm6, %v1002_v46  ;;  %v578_v56 = vmax.f32 %v524_v54, 0.0  ;;  %v924_v57 = vpop.f32.mrb[8].mxu1 }
 0x251   :  { %1005 = vmatprep.subr.bf16.mxu1 %v1239_v24  ;;  %v539_v58 = vadd.f32 %v924_v57, %v754_v28  ;;  %v533_v59 = vpop.f32.mrb[9].mxu1 }
 0x252   :  { %v1010_v60 = vpack.c.bf16 %v579_v55, %v578_v56  ;;  %v534_v61 = vadd.f32 %v754_v28, %v533_v59 }
 0x253   :  { %v581_v62 = vmax.f32 %v539_v58, 0.0 }
 0x254   :  { %v580_v63 = vmax.f32 %v534_v61, 0.0  ;;  %v927_v0 = vpop.f32.mrb[10].mxu1 }
 0x255   :  { %v549_v1 = vadd.f32 %v927_v0, %v754_v28  ;;  %v543_v2 = vpop.f32.mrb[11].mxu1 }
 0x256   :  { %v1014_v3 = vpack.c.bf16 %v581_v62, %v580_v63  ;;  %v544_v4 = vadd.f32 %v754_v28, %v543_v2 }
 0x257   :  { %v583_v5 = vmax.f32 %v549_v1, 0.0 }
 0x258   :  { %1008 = vmatpush3.bf16.xpose.msk.msra.mxu1 %vm1426_vm6, %v1006_v53  ;;  %v582_v6 = vmax.f32 %v544_v4, 0.0  ;;  %v930_v7 = vpop.f32.mrb[12].mxu1 }
 0x259   :  { %1009 = vmatprep.subr.bf16.mxu1 %v1239_v24  ;;  %v559_v8 = vadd.f32 %v930_v7, %v754_v28  ;;  %v553_v9 = vpop.f32.mrb[13].mxu1 }
 0x25a   :  { %v1018_v10 = vpack.c.bf16 %v583_v5, %v582_v6  ;;  %v554_v11 = vadd.f32 %v754_v28, %v553_v9 }
 0x25b   :  { %v585_v12 = vmax.f32 %v559_v8, 0.0 }
 0x25c   :  { %v584_v13 = vmax.f32 %v554_v11, 0.0  ;;  %v933_v14 = vpop.f32.mrb[14].mxu1 }
 0x25d   :  { %v569_v15 = vadd.f32 %v933_v14, %v754_v28  ;;  %v563_v16 = vpop.f32.mrb[15].mxu1 }
 0x25e   :  { %v1022_v17 = vpack.c.bf16 %v585_v12, %v584_v13  ;;  %v564_v18 = vadd.f32 %v754_v28, %v563_v16 }
 0x25f   :  { %v587_v19 = vmax.f32 %v569_v15, 0.0 }
 0x260   :  { %1012 = vmatpush3.bf16.xpose.msk.msra.mxu1 %vm1426_vm6, %v1010_v60  ;;  %v586_v20 = vmax.f32 %v564_v18, 0.0 }
 0x261   :  { %1013 = vmatprep.subr.bf16.mxu1 %v1239_v24 }
 0x262   :  { %v1026_v21 = vpack.c.bf16 %v587_v19, %v586_v20 }
 0x268   :  { %1016 = vmatpush3.bf16.xpose.msk.msra.mxu1 %vm1426_vm6, %v1014_v3 }
 0x269   :  { %1017 = vmatprep.subr.bf16.mxu1 %v1239_v24 }
 0x270   :  { %1020 = vmatpush3.bf16.xpose.msk.msra.mxu1 %vm1426_vm6, %v1018_v10 }
 0x271   :  { %1021 = vmatprep.subr.bf16.mxu1 %v1239_v24 }
 0x278   :  { %1024 = vmatpush3.bf16.xpose.msk.msra.mxu1 %vm1426_vm6, %v1022_v17 }
 0x279   :  { %1025 = vmatprep.subr.bf16.mxu1 %v1239_v24 }
 0x280   :  { %1028 = vmatpush3.bf16.xpose.msk.msra.mxu1 %vm1426_vm6, %v1026_v21 }
 0x287   :  { %967 = vmatmul.mubr.msk.f32.vlgmr.msra.gmra.mrb[16].mxu1 %vm595_vm5, %v588_v22 }
 0x35a   :  { %v713_v25 = vpop.f32.mrb[16].mxu1 }
 0x35b   :  { %v714_v26 = vadd.f32 %v713_v25, %v593_v23  ;;  %v968_v27 = vpop.f32.mrb[17].mxu1 }
 0x35d   :  { %717 = vst [vmem:[#allocation14] sm:$0x3f] %v714_v26 }
 0x35e   :  { %1209 = shalt.err (!%p1206_p4)
}
 0x35f   :  { %s1210_s14 = scalar_lea.hbm %s1473_s7, 128 }
 0x360   :  { %p1211_p5 = scmp.ne.s32.totalorder %s1473_s7, %s1210_s14  ;;  %p1214_p6 = scmp.lt.u32.totalorder %s1210_s14, %s1473_s7 }
 0x362   :  { %p1216_p7 = pnand %p1214_p6, %p1211_p5 }
 0x364   :  { %1219 = shalt.err (!%p1216_p7)
}
 0x365   :  { %727 = dma.vmem_to_hbm [thread:$0]  %s725_s16, 128, %s1473_s7, [#allocation4]  }
 0x366   :  { %1228 = dma.done.wait [#allocation4], 128  }
 0x367   :  { %1229 = vsyncadd [#allocation4], 4294967168 }
 0x368   :  { %731 = vsyncpa [#allocation3], 1 }
 0x369   :  { %732 = vsyncpa [#allocation6], 1 }
 0x36a   :  { %733 = vsyncpa [#allocation9], 1 }
 0x36b   :  { %734 = vsyncpa [#allocation12], 1 }
 0x36c   :  { %735 = vsyncpa [#allocation4], 1 }

</bundles_post_ra>
